<compile_context>
chip_gen: v7x
topology: tpu7x:2x2x1
jax: 0.10.0
libtpu: 0.0.40
codegen_flags: <defaults>
</compile_context>

<pallas_src>
import functools

import jax
import jax.numpy as jnp
from jax.experimental import pallas as pl
from jax.experimental.pallas import tpu as pltpu

_LANE = 128


def _round_up(n, m):
    return ((n + m - 1) // m) * m


def _pick_tile(dim_p, pref):
    """Largest multiple of 128 <= min(pref, dim_p) that divides dim_p."""
    t = min(_round_up(max(pref, _LANE), _LANE), dim_p)
    t = (t // _LANE) * _LANE
    while t > _LANE and dim_p % t:
        t -= _LANE
    return max(t, _LANE)


@functools.lru_cache(maxsize=1)
def _vmem_budget_bytes():
    """Per-TensorCore VMEM budget with headroom for Mosaic scratch."""
    try:
        cap = int(pltpu.get_tpu_info().vmem_capacity_bytes)
    except Exception:
        cap = 64 * 1024 * 1024            # conservative (v7x-sized) default
    return int(cap * 7 // 8)              # ~112 MiB on 128 MiB parts, ~56 MiB on v7x


@functools.lru_cache(maxsize=1)
def _buffered_one_supported():
    """Probe once whether pipeline_mode=pl.Buffered(1) lowers+compiles."""
    try:
        const_spec = pl.BlockSpec((8, 128), lambda i: (0, 0),
                                  pipeline_mode=pl.Buffered(1))

        def k(a_ref, c_ref, o_ref):
            o_ref[...] = a_ref[...] + c_ref[...]

        fn = pl.pallas_call(
            k,
            out_shape=jax.ShapeDtypeStruct((16, 128), jnp.float32),
            grid_spec=pltpu.PrefetchScalarGridSpec(
                num_scalar_prefetch=0, grid=(2,),
                in_specs=[pl.BlockSpec((8, 128), lambda i: (i, 0)), const_spec],
                out_specs=pl.BlockSpec((8, 128), lambda i: (i, 0))))
        jax.jit(fn).lower(
            jax.ShapeDtypeStruct((16, 128), jnp.float32),
            jax.ShapeDtypeStruct((8, 128), jnp.float32)).compile()
        return True
    except Exception:
        return False


# ---------------------------------------------------------------------------
# Kernels
# ---------------------------------------------------------------------------
def _make_resident_kernel(n_layers):
    """Fused MLP with all (small) layer weights VMEM-resident."""

    def kernel(x_ref, *refs):
        o_ref = refs[-1]
        wb = refs[:-1]
        h = x_ref[...]
        for li in range(n_layers):
            w = wb[2 * li][...]
            b = wb[2 * li + 1][...]
            h = jnp.dot(h.astype(w.dtype), w, preferred_element_type=jnp.float32)
            h = h + b.astype(jnp.float32)
            if li < n_layers - 1:
                h = jnp.maximum(h, 0.0)           # ReLU
                # Dropout(0.1): identity at inference.
        o_ref[...] = h.astype(o_ref.dtype)

    return kernel


def _mlp2_streamk_kernel(x_ref, w1_ref, b1_ref, w2_ref, b2_ref, o_ref, acc_ref):
    """Fused Linear->ReLU->(Dropout id)->Linear with the hidden dim streamed
    over the innermost grid axis; f32 accumulator lives in VMEM scratch."""
    k = pl.program_id(1)

    @pl.when(k == 0)
    def _():
        acc_ref[...] = jnp.zeros_like(acc_ref)

    w1 = w1_ref[...]
    h = jnp.dot(x_ref[...].astype(w1.dtype), w1,
                preferred_element_type=jnp.float32)
    h = jnp.maximum(h + b1_ref[...].astype(jnp.float32), 0.0)   # ReLU
    # Dropout(0.1): identity at inference.
    w2 = w2_ref[...]
    acc_ref[...] += jnp.dot(h.astype(w2.dtype), w2,
                            preferred_element_type=jnp.float32)

    @pl.when(k == pl.num_programs(1) - 1)
    def _():
        # b2 folded into the final store (no broadcast add before the loop).
        o_ref[...] = (acc_ref[...] + b2_ref[...].astype(jnp.float32)
                      ).astype(o_ref.dtype)


def _make_linear_kernel(relu):
    """Single Linear (+ optional ReLU) with (M,N,K)-tiled streaming weights."""

    def kernel(x_ref, w_ref, b_ref, o_ref, acc_ref):
        k = pl.program_id(2)

        @pl.when(k == 0)
        def _():
            acc_ref[...] = jnp.zeros_like(acc_ref)

        w = w_ref[...]
        acc_ref[...] += jnp.dot(x_ref[...].astype(w.dtype), w,
                                preferred_element_type=jnp.float32)

        @pl.when(k == pl.num_programs(2) - 1)
        def _():
            r = acc_ref[...] + b_ref[...].astype(jnp.float32)
            if relu:
                r = jnp.maximum(r, 0.0)
                # Dropout(0.1): identity at inference.
            o_ref[...] = r.astype(o_ref.dtype)

    return kernel


# ---------------------------------------------------------------------------
# pallas_call builders (called at trace time inside the jitted apply)
# ---------------------------------------------------------------------------
def _mlp_resident(x_p, ws_p, bs_p, dims_p, tm, odtype, budget, const_kw):
    n_layers = len(ws_p)
    Mp = x_p.shape[0]
    grid = (Mp // tm,)

    in_specs = [pl.BlockSpec((tm, dims_p[0]), lambda i: (i, 0))]
    operands = [x_p]
    for li in range(n_layers):
        in_specs.append(pl.BlockSpec((dims_p[li], dims_p[li + 1]),
                                     lambda i: (0, 0), **const_kw))
        in_specs.append(pl.BlockSpec((1, dims_p[li + 1]),
                                     lambda i: (0, 0), **const_kw))
        operands += [ws_p[li], bs_p[li]]

    flops = sum(2 * Mp * dims_p[i] * dims_p[i + 1] for i in range(n_layers))
    bytes_accessed = (int(x_p.size) * x_p.dtype.itemsize
                      + sum(int(a.size) * a.dtype.itemsize for a in operands[1:])
                      + Mp * dims_p[-1] * jnp.dtype(odtype).itemsize)

    return pl.pallas_call(
        _make_resident_kernel(n_layers),
        out_shape=jax.ShapeDtypeStruct((Mp, dims_p[-1]), odtype),
        grid_spec=pltpu.PrefetchScalarGridSpec(
            num_scalar_prefetch=0, grid=grid,
            in_specs=in_specs,
            out_specs=pl.BlockSpec((tm, dims_p[-1]), lambda i: (i, 0))),
        compiler_params=pltpu.CompilerParams(
            dimension_semantics=("parallel",),
            vmem_limit_bytes=budget),
        cost_estimate=pl.CostEstimate(flops=int(flops), transcendentals=0,
                                      bytes_accessed=int(bytes_accessed)),
    )(*operands)


def _mlp2_streamed(x_p, ws_p, bs_p, dims_p, tm, tk_pref, odtype, budget,
                   const_kw):
    (w1, w2), (b1, b2) = ws_p, bs_p
    Mp = x_p.shape[0]
    d_in_p, d_ff_p, d_out_p = dims_p
    xi = x_p.dtype.itemsize
    wi = w1.dtype.itemsize

    # tk: multiple of 128 that divides d_ff_p; shrink until the double-
    # buffered weight chunks + f32 accumulator + I/O tiles fit the budget.
    tk = _pick_tile(d_ff_p, tk_pref)
    while tk > _LANE:
        need = (2 * tk * (d_in_p + d_out_p) * wi      # w1/w2 chunk double-buf
                + 4 * tm * d_out_p                    # f32 accumulator scratch
                + 4 * tm * tk                         # f32 hidden chunk
                + 2 * tm * (d_in_p + d_out_p) * xi)   # x / out tiles
        if need <= budget:
            break
        tk = _pick_tile(d_ff_p, tk - _LANE)
    grid = (Mp // tm, d_ff_p // tk)

    flops = 2 * Mp * d_ff_p * (d_in_p + d_out_p)
    bytes_accessed = (int(x_p.size) * xi
                      + int(w1.size) * w1.dtype.itemsize
                      + int(w2.size) * w2.dtype.itemsize
                      + int(b1.size) * b1.dtype.itemsize
                      + int(b2.size) * b2.dtype.itemsize
                      + Mp * d_out_p * jnp.dtype(odtype).itemsize)

    return pl.pallas_call(
        _mlp2_streamk_kernel,
        out_shape=jax.ShapeDtypeStruct((Mp, d_out_p), odtype),
        grid_spec=pltpu.PrefetchScalarGridSpec(
            num_scalar_prefetch=0,
            grid=grid,
            in_specs=[
                pl.BlockSpec((tm, d_in_p), lambda i, k: (i, 0)),
                pl.BlockSpec((d_in_p, tk), lambda i, k: (0, k)),
                pl.BlockSpec((1, tk), lambda i, k: (0, k)),
                pl.BlockSpec((tk, d_out_p), lambda i, k: (k, 0)),
                pl.BlockSpec((1, d_out_p), lambda i, k: (0, 0), **const_kw),
            ],
            out_specs=pl.BlockSpec((tm, d_out_p), lambda i, k: (i, 0)),
            scratch_shapes=[pltpu.VMEM((tm, d_out_p), jnp.float32)]),
        compiler_params=pltpu.CompilerParams(
            dimension_semantics=("parallel", "arbitrary"),
            vmem_limit_bytes=budget),
        cost_estimate=pl.CostEstimate(flops=int(flops), transcendentals=0,
                                      bytes_accessed=int(bytes_accessed)),
    )(x_p, w1, b1, w2, b2)


def _linear_streamed(x_p, w_p, b_p, tm, tk_pref, *, relu, out_dtype, budget):
    Mp, Kp = x_p.shape
    _, Np = w_p.shape
    tn = _pick_tile(Np, 512)
    tk = _pick_tile(Kp, tk_pref)
    wi = w_p.dtype.itemsize
    while tk > _LANE:
        need = (2 * (tm * tk + tk * tn) * wi + 4 * tm * tn
                + 2 * tm * tn * jnp.dtype(out_dtype).itemsize)
        if need <= budget:
            break
        tk = _pick_tile(Kp, tk - _LANE)
    grid = (Mp // tm, Np // tn, Kp // tk)

    return pl.pallas_call(
        _make_linear_kernel(relu),
        out_shape=jax.ShapeDtypeStruct((Mp, Np), out_dtype),
        grid_spec=pltpu.PrefetchScalarGridSpec(
            num_scalar_prefetch=0, grid=grid,
            in_specs=[pl.BlockSpec((tm, tk), lambda i, j, k: (i, k)),
                      pl.BlockSpec((tk, tn), lambda i, j, k: (k, j)),
                      pl.BlockSpec((1, tn), lambda i, j, k: (0, j))],
            out_specs=pl.BlockSpec((tm, tn), lambda i, j, k: (i, j)),
            scratch_shapes=[pltpu.VMEM((tm, tn), jnp.float32)]),
        compiler_params=pltpu.CompilerParams(
            dimension_semantics=("parallel", "parallel", "arbitrary"),
            vmem_limit_bytes=budget),
        cost_estimate=pl.CostEstimate(
            flops=2 * Mp * Kp * Np, transcendentals=0,
            bytes_accessed=int(x_p.size) * x_p.dtype.itemsize
            + int(w_p.size) * wi + int(b_p.size) * b_p.dtype.itemsize
            + Mp * Np * jnp.dtype(out_dtype).itemsize),
    )(x_p, w_p, b_p)


# ---------------------------------------------------------------------------
# Public API
# ---------------------------------------------------------------------------
def prepare_mlp_params(weights, biases, param_dtype=None):
    """Pad weights/biases to 128-lane multiples ONCE (hoisted out of forward).

    weights[i]: (sizes[i], sizes[i+1])   (transposed vs torch Linear.weight)
    biases[i] : (sizes[i+1],)
    param_dtype: optional cast (e.g. jnp.bfloat16 for the v6e/v7x MXU path).
    """
    dims = [weights[0].shape[0]] + [w.shape[1] for w in weights]
    dims_p = [_round_up(d, _LANE) for d in dims]
    ws_p, bs_p = [], []
    for i, (w, b) in enumerate(zip(weights, biases)):
        if param_dtype is not None:
            w = w.astype(param_dtype)
        pad_w = ((0, dims_p[i] - w.shape[0]), (0, dims_p[i + 1] - w.shape[1]))
        if pad_w != ((0, 0), (0, 0)):
            w = jnp.pad(w, pad_w)
        ws_p.append(w)
        b2 = b.reshape(1, -1).astype(jnp.float32)
        pad_b = dims_p[i + 1] - b.shape[0]
        if pad_b:
            b2 = jnp.pad(b2, ((0, 0), (0, pad_b)))
        bs_p.append(b2)
    return ws_p, bs_p, tuple(dims), tuple(dims_p)


def make_mlp(weights, biases, *, param_dtype=None, tm=None, tk=512,
             out_dtype=None):
    """Returns a jitted apply(x) implementing the fused MLP forward."""
    ws_p, bs_p, dims, dims_p = prepare_mlp_params(weights, biases, param_dtype)
    n_layers = len(ws_p)
    d_in, d_out = dims[0], dims[-1]
    d_in_p, d_out_p = dims_p[0], dims_p[-1]

    budget = _vmem_budget_bytes()
    buffered_ok = _buffered_one_supported()
    const_kw = dict(pipeline_mode=pl.Buffered(1)) if buffered_ok else {}
    wbuf = 1 if buffered_ok else 2
    w_bytes = (sum(int(w.size) * w.dtype.itemsize for w in ws_p)
               + sum(int(b.size) * b.dtype.itemsize for b in bs_p))

    def apply(x):
        assert x.shape[-1] == d_in
        lead = x.shape[:-1]
        x2d = x.reshape(-1, d_in)
        M = x2d.shape[0]
        itemsize = x.dtype.itemsize
        sub = 8 if itemsize >= 4 else 16

        # Row tile: big enough to amortize per-step overhead, small enough to
        # give >1 tile (megacore / v7x 2-TC sharding) on non-tiny M.
        tm_ = tm if tm is not None else (512 if itemsize == 2 else 256)
        tm_ = max(sub, _round_up(min(tm_, _round_up(M, sub)), sub))
        Mp = _round_up(M, tm_)

        if Mp != M or d_in_p != d_in:
            x_p = jnp.pad(x2d, ((0, Mp - M), (0, d_in_p - d_in)))
        else:
            x_p = x2d

        odtype = out_dtype or x.dtype

        act_bytes = 4 * tm_ * max(dims_p)                 # f32 intermediates
        io_bytes = 2 * tm_ * (d_in_p + d_out_p) * itemsize
        resident_fits = (wbuf * w_bytes <= int(0.6 * budget)
                         and wbuf * w_bytes + 3 * act_bytes + io_bytes <= budget)

        if n_layers == 2:
            # Fused 2-layer path; hidden dim streamed over a reduction grid
            # axis (weights never fully resident).
            out_p = _mlp2_streamed(x_p, ws_p, bs_p, dims_p, tm_, tk, odtype,
                                   budget, const_kw)
        elif resident_fits:
            out_p = _mlp_resident(x_p, ws_p, bs_p, dims_p, tm_, odtype,
                                  budget, const_kw)
        else:
            # Weights too large for one fused call: stream layer by layer.
            h = x_p
            for li in range(n_layers):
                h = _linear_streamed(
                    h, ws_p[li], bs_p[li], tm_, tk,
                    relu=(li < n_layers - 1),
                    out_dtype=(odtype if li == n_layers - 1 else x.dtype),
                    budget=budget)
            out_p = h

        if Mp != M or d_out_p != d_out:
            out_p = out_p[:M, :d_out]
        return out_p.reshape(*lead, d_out)

    return jax.jit(apply)


def init_mlp_params(key, sizes, dtype=jnp.float32):
    """PyTorch-Linear-style init (uniform +-1/sqrt(fan_in)); weights stored
    already transposed to (in_features, out_features)."""
    ws, bs = [], []
    keys = jax.random.split(key, 2 * (len(sizes) - 1))
    for i in range(len(sizes) - 1):
        bound = 1.0 / (sizes[i] ** 0.5)
        ws.append(jax.random.uniform(keys[2 * i], (sizes[i], sizes[i + 1]),
                                     dtype, -bound, bound))
        bs.append(jax.random.uniform(keys[2 * i + 1], (sizes[i + 1],),
                                     dtype, -bound, bound))
    return ws, bs


def mlp_reference(x, ws, bs):
    lead = x.shape[:-1]
    h = x.reshape(-1, x.shape[-1])
    for i, (w, b) in enumerate(zip(ws, bs)):
        h = h @ w + b
        if i < len(ws) - 1:
            h = jnp.maximum(h, 0.0)
    return h.reshape(*lead, ws[-1].shape[1])


if __name__ == "__main__":
    key = jax.random.PRNGKey(0)
    kx, kp1, kp2 = jax.random.split(key, 3)

    batch, seq = 2, 8
    x = jax.random.normal(kx, (batch, seq, 32), jnp.float32)

    # Test 1: 3-Linear-layer MLP -> resident fused path.
    sizes1 = (32, 64, 48, 16)
    ws1, bs1 = init_mlp_params(kp1, sizes1)
    mlp1 = make_mlp(ws1, bs1)
    out1 = jax.block_until_ready(mlp1(x))
    ref1 = mlp_reference(x, ws1, bs1)
    assert out1.shape == (batch, seq, sizes1[-1])
    assert jnp.allclose(out1, ref1, atol=1e-4, rtol=1e-4), \
        float(jnp.max(jnp.abs(out1 - ref1)))

    # Test 2: 2-Linear-layer MLP -> fused path with the hidden dim streamed
    # over a reduction grid axis (tk=128 -> 2 K-steps, exercises accumulator).
    sizes2 = (32, 256, 16)
    ws2, bs2 = init_mlp_params(kp2, sizes2)
    mlp2 = make_mlp(ws2, bs2, tk=128)
    out2 = jax.block_until_ready(mlp2(x))
    ref2 = mlp_reference(x, ws2, bs2)
    assert out2.shape == (batch, seq, sizes2[-1])
    assert jnp.allclose(out2, ref2, atol=1e-4, rtol=1e-4), \
        float(jnp.max(jnp.abs(out2 - ref2)))

    print("KERNEL_OK")
</pallas_src>

<mosaic_0001>
module attributes {stable_mosaic.version = 11 : i64} {
  func.func @kernel(%arg0: i32, %arg1: memref<16x128xf32, #tpu.memory_space<vmem>>, %arg2: memref<128x128xf32, #tpu.memory_space<vmem>>, %arg3: memref<1x128xf32, #tpu.memory_space<vmem>>, %arg4: memref<128x128xf32, #tpu.memory_space<vmem>>, %arg5: memref<1x128xf32, #tpu.memory_space<vmem>>, %arg6: memref<128x128xf32, #tpu.memory_space<vmem>>, %arg7: memref<1x128xf32, #tpu.memory_space<vmem>>, %arg8: memref<16x128xf32, #tpu.memory_space<vmem>>) attributes {dimension_semantics = [#tpu.dimension_semantics<parallel>], iteration_bounds = array<i64: 1>, scalar_prefetch = 0 : i64, scratch_operands = 0 : i64, tpu.core_type = #tpu.core_type<tc>, window_params = [{transform_indices = @transform_0, window_bounds = array<i64: 16, 128>}, {pipeline_mode = #tpu.pipeline_mode<synchronous>, transform_indices = @transform_1, window_bounds = array<i64: 128, 128>}, {pipeline_mode = #tpu.pipeline_mode<synchronous>, transform_indices = @transform_2, window_bounds = array<i64: 1, 128>}, {pipeline_mode = #tpu.pipeline_mode<synchronous>, transform_indices = @transform_3, window_bounds = array<i64: 128, 128>}, {pipeline_mode = #tpu.pipeline_mode<synchronous>, transform_indices = @transform_4, window_bounds = array<i64: 1, 128>}, {pipeline_mode = #tpu.pipeline_mode<synchronous>, transform_indices = @transform_5, window_bounds = array<i64: 128, 128>}, {pipeline_mode = #tpu.pipeline_mode<synchronous>, transform_indices = @transform_6, window_bounds = array<i64: 1, 128>}, {transform_indices = @transform_7, window_bounds = array<i64: 16, 128>}]} {
    %c0 = arith.constant 0 : index
    %c0_0 = arith.constant 0 : index
    %0 = vector.load %arg1[%c0, %c0_0] : memref<16x128xf32, #tpu.memory_space<vmem>>, vector<16x128xf32>
    %c0_1 = arith.constant 0 : index
    %c0_2 = arith.constant 0 : index
    %1 = vector.load %arg2[%c0_1, %c0_2] : memref<128x128xf32, #tpu.memory_space<vmem>>, vector<128x128xf32>
    %c0_3 = arith.constant 0 : index
    %c0_4 = arith.constant 0 : index
    %2 = vector.load %arg3[%c0_3, %c0_4] : memref<1x128xf32, #tpu.memory_space<vmem>>, vector<1x128xf32>
    %cst = arith.constant dense<0.000000e+00> : vector<16x128xf32>
    %3 = tpu.matmul %0, %1, %cst {dimension_numbers = #tpu.dot_dimension_numbers<[1], [0], [0], [1], [0, 0, 1, 1], [], []>} : vector<16x128xf32>, vector<128x128xf32>, vector<16x128xf32> -> vector<16x128xf32>
    %4 = vector.broadcast %2 : vector<1x128xf32> to vector<16x128xf32>
    %5 = arith.addf %3, %4 : vector<16x128xf32>
    %cst_5 = arith.constant 0.000000e+00 : f32
    %6 = vector.broadcast %cst_5 : f32 to vector<16x128xf32>
    %7 = arith.maximumf %5, %6 : vector<16x128xf32>
    %c0_6 = arith.constant 0 : index
    %c0_7 = arith.constant 0 : index
    %8 = vector.load %arg4[%c0_6, %c0_7] : memref<128x128xf32, #tpu.memory_space<vmem>>, vector<128x128xf32>
    %c0_8 = arith.constant 0 : index
    %c0_9 = arith.constant 0 : index
    %9 = vector.load %arg5[%c0_8, %c0_9] : memref<1x128xf32, #tpu.memory_space<vmem>>, vector<1x128xf32>
    %cst_10 = arith.constant dense<0.000000e+00> : vector<16x128xf32>
    %10 = tpu.matmul %7, %8, %cst_10 {dimension_numbers = #tpu.dot_dimension_numbers<[1], [0], [0], [1], [0, 0, 1, 1], [], []>} : vector<16x128xf32>, vector<128x128xf32>, vector<16x128xf32> -> vector<16x128xf32>
    %11 = vector.broadcast %9 : vector<1x128xf32> to vector<16x128xf32>
    %12 = arith.addf %10, %11 : vector<16x128xf32>
    %cst_11 = arith.constant 0.000000e+00 : f32
    %13 = vector.broadcast %cst_11 : f32 to vector<16x128xf32>
    %14 = arith.maximumf %12, %13 : vector<16x128xf32>
    %c0_12 = arith.constant 0 : index
    %c0_13 = arith.constant 0 : index
    %15 = vector.load %arg6[%c0_12, %c0_13] : memref<128x128xf32, #tpu.memory_space<vmem>>, vector<128x128xf32>
    %c0_14 = arith.constant 0 : index
    %c0_15 = arith.constant 0 : index
    %16 = vector.load %arg7[%c0_14, %c0_15] : memref<1x128xf32, #tpu.memory_space<vmem>>, vector<1x128xf32>
    %cst_16 = arith.constant dense<0.000000e+00> : vector<16x128xf32>
    %17 = tpu.matmul %14, %15, %cst_16 {dimension_numbers = #tpu.dot_dimension_numbers<[1], [0], [0], [1], [0, 0, 1, 1], [], []>} : vector<16x128xf32>, vector<128x128xf32>, vector<16x128xf32> -> vector<16x128xf32>
    %18 = vector.broadcast %16 : vector<1x128xf32> to vector<16x128xf32>
    %19 = arith.addf %17, %18 : vector<16x128xf32>
    %c0_17 = arith.constant 0 : index
    %c0_18 = arith.constant 0 : index
    %20 = vector.load %arg8[%c0_17, %c0_18] : memref<16x128xf32, #tpu.memory_space<vmem>>, vector<16x128xf32>
    tpu.vector_store %arg8[%c0_17, %c0_18], %19 {strides = array<i32>} : memref<16x128xf32, #tpu.memory_space<vmem>>, vector<16x128xf32>,
    return
  }
  func.func @transform_0(%arg0: i32) -> (i32, i32) {
    %c0_i32 = arith.constant 0 : i32
    %c0_i32_0 = arith.constant 0 : i32
    return %arg0, %c0_i32 : i32, i32
  }
  func.func @transform_1(%arg0: i32) -> (i32, i32) {
    %c0_i32 = arith.constant 0 : i32
    %c0_i32_0 = arith.constant 0 : i32
    %c0_i32_1 = arith.constant 0 : i32
    return %c0_i32, %c0_i32_0 : i32, i32
  }
  func.func @transform_2(%arg0: i32) -> (i32, i32) {
    %c0_i32 = arith.constant 0 : i32
    %c0_i32_0 = arith.constant 0 : i32
    %c0_i32_1 = arith.constant 0 : i32
    return %c0_i32, %c0_i32_0 : i32, i32
  }
  func.func @transform_3(%arg0: i32) -> (i32, i32) {
    %c0_i32 = arith.constant 0 : i32
    %c0_i32_0 = arith.constant 0 : i32
    %c0_i32_1 = arith.constant 0 : i32
    return %c0_i32, %c0_i32_0 : i32, i32
  }
  func.func @transform_4(%arg0: i32) -> (i32, i32) {
    %c0_i32 = arith.constant 0 : i32
    %c0_i32_0 = arith.constant 0 : i32
    %c0_i32_1 = arith.constant 0 : i32
    return %c0_i32, %c0_i32_0 : i32, i32
  }
  func.func @transform_5(%arg0: i32) -> (i32, i32) {
    %c0_i32 = arith.constant 0 : i32
    %c0_i32_0 = arith.constant 0 : i32
    %c0_i32_1 = arith.constant 0 : i32
    return %c0_i32, %c0_i32_0 : i32, i32
  }
  func.func @transform_6(%arg0: i32) -> (i32, i32) {
    %c0_i32 = arith.constant 0 : i32
    %c0_i32_0 = arith.constant 0 : i32
    %c0_i32_1 = arith.constant 0 : i32
    return %c0_i32, %c0_i32_0 : i32, i32
  }
  func.func @transform_7(%arg0: i32) -> (i32, i32) {
    %c0_i32 = arith.constant 0 : i32
    %c0_i32_0 = arith.constant 0 : i32
    return %arg0, %c0_i32 : i32, i32
  }
}

</mosaic_0001>

<bundles_post_ra>
// kernel: apply.1
= control target key start
LH: loop header
LB: loop body
LE: loop exit
PB: predicated region body
PF: predicated region fallthrough
CT: control target
= control target key end

     0   :  { %12 = vsyncpa [#allocation3], 0  ;;  %s826_s0 = inlined_call_operand.vmem [shape: f32[16,128], index: 0, kind: input, shape index: {}]   ;;  %s827_s1 = inlined_call_operand.hbm [shape: f32[128,128], index: 1, kind: input, shape index: {}]   ;;  %s828_s2 = inlined_call_operand.vmem [shape: f32[1,128], index: 2, kind: input, shape index: {}]   ;;  %s829_s3 = inlined_call_operand.hbm [shape: f32[128,128], index: 3, kind: input, shape index: {}]   ;;  %s830_s4 = inlined_call_operand.vmem [shape: f32[1,128], index: 4, kind: input, shape index: {}]   ;;  %s831_s5 = inlined_call_operand.hbm [shape: f32[128,128], index: 5, kind: input, shape index: {}]   ;;  %s832_s6 = inlined_call_operand.vmem [shape: f32[1,128], index: 6, kind: input, shape index: {}]   ;;  %s833_s7 = inlined_call_operand.vmem [shape: f32[16,128], index: 7, kind: output, shape index: {}]  }
   0x1   :  { %13 = vsyncpa [#allocation5], 0  ;;  %s708_s24 = smov [#allocation4]   ;;  %s709_s26 = smov [#allocation2]  }
   0x2   :  { %s35_s25 = sshll.u32 %s708_s24, 4  ;;  %s21_s27 = sshll.u32 %s709_s26, 4  ;;  %s36_s25 = int_to_ptr.vmem [resolvable:$true] %s35_s25  ;;  %s753_s27 = int_to_ptr.vmem [resolvable:$true] %s21_s27 }
   0x3   :  { %s638_s30 = scalar_lea.hbm %s829_s3, 2048 }
   0x4   :  { %p639_p0 = scmp.ne.s32.totalorder %s829_s3, %s638_s30  ;;  %p642_p1 = scmp.lt.u32.totalorder %s638_s30, %s829_s3 }
   0x6   :  { %p644_p2 = pnand %p642_p1, %p639_p0 }
   0x8   :  { %647 = shalt.err (!%p644_p2)
}
   0x9   :  { %s648_s12 = scalar_lea.vmem %s36_s25, 2048  ;;  %p653_p4 = scmp.lt.s32.totalorder %s36_s25, %s36_s25 }
   0xa   :  { %p649_p3 = scmp.ne.s32.totalorder %s36_s25, %s648_s12  ;;  %p654_p5 = scmp.lt.s32.totalorder %s648_s12, %s648_s12 }
   0xc   :  { %p655_p6 = por %p654_p5, %p653_p4 }
   0xe   :  { %p656_p7 = pnand %p655_p6, %p649_p3 }
  0x10   :  { %659 = shalt.err (!%p656_p7)
}
  0x11   :  { %s710_s13 = smov 128   ;;  %s711_s14 = smov 8  }
  0x12   :  { %41 = dma.hbm_to_vmem [thread:$0]  %s829_s3, 2048, %s36_s25, [#allocation5], %s710_s13, %s710_s13, %s711_s14  }
  0x13   :  { %s660_s19 = scalar_lea.hbm %s827_s1, 2048 }
  0x14   :  { %p661_p8 = scmp.ne.s32.totalorder %s827_s1, %s660_s19  ;;  %p664_p9 = scmp.lt.u32.totalorder %s660_s19, %s827_s1 }
  0x16   :  { %p666_p10 = pnand %p664_p9, %p661_p8 }
  0x18   :  { %669 = shalt.err (!%p666_p10)
}
  0x19   :  { %s670_s24 = scalar_lea.vmem %s753_s27, 2048  ;;  %p675_p12 = scmp.lt.s32.totalorder %s753_s27, %s753_s27 }
  0x1a   :  { %p671_p11 = scmp.ne.s32.totalorder %s753_s27, %s670_s24  ;;  %p676_p13 = scmp.lt.s32.totalorder %s670_s24, %s670_s24 }
  0x1c   :  { %p677_p0 = por %p676_p13, %p675_p12 }
  0x1e   :  { %p678_p1 = pnand %p677_p0, %p671_p11 }
  0x20   :  { %681 = shalt.err (!%p678_p1)
}
  0x21   :  { %27 = dma.hbm_to_vmem [thread:$0]  %s827_s1, 2048, %s753_s27, [#allocation3], %s710_s13, %s710_s13, %s711_s14  }
  0x22   :  { %s712_s26 = smov [#allocation6]   ;;  %s682_s8 = scalar_lea.hbm %s831_s5, 2048 }
  0x23   :  { %s49_s28 = sshll.u32 %s712_s26, 4  ;;  %p683_p2 = scmp.ne.s32.totalorder %s831_s5, %s682_s8  ;;  %s50_s28 = int_to_ptr.vmem [resolvable:$true] %s49_s28 }
  0x24   :  { %p686_p3 = scmp.lt.u32.totalorder %s682_s8, %s831_s5 }
  0x26   :  { %p688_p4 = pnand %p686_p3, %p683_p2 }
  0x28   :  { %691 = shalt.err (!%p688_p4)
}
  0x29   :  { %s692_s15 = scalar_lea.vmem %s50_s28, 2048  ;;  %p697_p6 = scmp.lt.s32.totalorder %s50_s28, %s50_s28 }
  0x2a   :  { %p693_p5 = scmp.ne.s32.totalorder %s50_s28, %s692_s15  ;;  %p698_p7 = scmp.lt.s32.totalorder %s692_s15, %s692_s15 }
  0x2c   :  { %p699_p8 = por %p698_p7, %p697_p6 }
  0x2e   :  { %p700_p9 = pnand %p699_p8, %p693_p5 }
  0x30   :  { %703 = shalt.err (!%p700_p9)
}
  0x31   :  { %55 = dma.hbm_to_vmem [thread:$0]  %s831_s5, 2048, %s50_s28, [#allocation5], %s710_s13, %s710_s13, %s711_s14  }
  0x32   :  { %704 = dma.done.wait [#allocation3], 2048  }
  0x33   :  { %705 = vsyncadd [#allocation3], 4294965248 }
  0x34   :  { %706 = dma.done.wait [#allocation5], 4096  }
  0x35   :  { %707 = vsyncadd [#allocation5], 4294963200  ;;  %v69_v0 = vld [vmem:[#allocation2] sm:$0xff]  ;;  %v70_v1 = vld [vmem:[#allocation2 + $0x8] sm:$0xff] }
  0x36   :  { %v71_v2 = vld [vmem:[#allocation2 + $0x10] sm:$0xff]  ;;  %v537_v3 = vpack.c.bf16 %v70_v1, %v69_v0  ;;  %v72_v4 = vld [vmem:[#allocation2 + $0x18] sm:$0xff]  ;;  %v73_v6 = vld [vmem:[#allocation2 + $0x20] sm:$0xff] }
  0x37   :  { %v541_v5 = vpack.c.bf16 %v72_v4, %v71_v2  ;;  %v74_v7 = vld [vmem:[#allocation2 + $0x28] sm:$0xff]  ;;  %v75_v9 = vld [vmem:[#allocation2 + $0x30] sm:$0xff]  ;;  %v76_v10 = vld [vmem:[#allocation2 + $0x38] sm:$0xff] }
  0x38   :  { %538 = vmatprep.subr.bf16.mxu0 %v537_v3  ;;  %v545_v8 = vpack.c.bf16 %v74_v7, %v73_v6  ;;  %v67_v11 = vld [vmem:[%s826_s0] sm:$0xff]  ;;  %v170_v13 = vld [vmem:[#allocation4 + $0x8] sm:$0xff]  ;;  %v171_v14 = vld [vmem:[#allocation4 + $0x10] sm:$0xff]  ;;  %v549_v20 = vpack.c.bf16 %v76_v10, %v75_v9 }
  0x39   :  { %540 = vmatpush3.bf16.msra.mxu0 %v537_v3  ;;  %464 = vmatprep.mubr.f32.mxu0 %v67_v11  ;;  %v169_v12 = vld [vmem:[#allocation4] sm:$0xff]  ;;  %v172_v16 = vld [vmem:[#allocation4 + $0x18] sm:$0xff]  ;;  %v174_v19 = vld [vmem:[#allocation4 + $0x28] sm:$0xff] }
  0x3a   :  { %542 = vmatprep.subr.bf16.mxu0 %v541_v5  ;;  %v569_v15 = vpack.c.bf16 %v170_v13, %v169_v12  ;;  %v573_v17 = vpack.c.bf16 %v172_v16, %v171_v14  ;;  %v173_v18 = vld [vmem:[#allocation4 + $0x20] sm:$0xff]  ;;  %v78_v22 = vld [vmem:[#allocation2 + $0x48] sm:$0xff]  ;;  %v175_v24 = vld [vmem:[#allocation4 + $0x30] sm:$0xff] }
  0x3b   :  { %v77_v21 = vld [vmem:[#allocation2 + $0x40] sm:$0xff]  ;;  %v577_v23 = vpack.c.bf16 %v174_v19, %v173_v18  ;;  %v176_v25 = vld [vmem:[#allocation4 + $0x38] sm:$0xff]  ;;  %v79_v27 = vld [vmem:[#allocation2 + $0x50] sm:$0xff] }
  0x3c   :  { %570 = vmatprep.subr.bf16.mxu1 %v569_v15  ;;  %v553_v26 = vpack.c.bf16 %v78_v22, %v77_v21  ;;  %v80_v28 = vld [vmem:[#allocation2 + $0x58] sm:$0xff]  ;;  %v581_v29 = vpack.c.bf16 %v176_v25, %v175_v24  ;;  %v177_v30 = vld [vmem:[#allocation4 + $0x40] sm:$0xff]  ;;  %v178_v31 = vld [vmem:[#allocation4 + $0x48] sm:$0xff] }
  0x3d   :  { %544 = vmatpush3.bf16.msra.mxu0 %v541_v5  ;;  %572 = vmatpush3.bf16.msra.mxu1 %v569_v15  ;;  %v557_v32 = vpack.c.bf16 %v80_v28, %v79_v27  ;;  %v81_v33 = vld [vmem:[#allocation2 + $0x60] sm:$0xff]  ;;  %v82_v34 = vld [vmem:[#allocation2 + $0x68] sm:$0xff]  ;;  %v585_v35 = vpack.c.bf16 %v178_v31, %v177_v30  ;;  %v179_v36 = vld [vmem:[#allocation4 + $0x50] sm:$0xff] }
  0x3e   :  { %546 = vmatprep.subr.bf16.mxu0 %v545_v8  ;;  %574 = vmatprep.subr.bf16.mxu1 %v573_v17  ;;  %v180_v37 = vld [vmem:[#allocation4 + $0x58] sm:$0xff]  ;;  %v561_v38 = vpack.c.bf16 %v82_v34, %v81_v33  ;;  %v83_v39 = vld [vmem:[#allocation2 + $0x70] sm:$0xff]  ;;  %v181_v42 = vld [vmem:[#allocation4 + $0x60] sm:$0xff] }
  0x3f   :  { %v84_v40 = vld [vmem:[#allocation2 + $0x78] sm:$0xff]  ;;  %v589_v41 = vpack.c.bf16 %v180_v37, %v179_v36  ;;  %v182_v43 = vld [vmem:[#allocation4 + $0x68] sm:$0xff]  ;;  %v183_v47 = vld [vmem:[#allocation4 + $0x70] sm:$0xff] }
  0x40   :  { %v565_v44 = vpack.c.bf16 %v84_v40, %v83_v39  ;;  %v593_v45 = vpack.c.bf16 %v182_v43, %v181_v42  ;;  %v68_v46 = vld [vmem:[%s826_s0 + $0x8] sm:$0xff]  ;;  %v184_v48 = vld [vmem:[#allocation4 + $0x78] sm:$0xff]  ;;  %v269_v50 = vld [vmem:[#allocation6] sm:$0xff] }
  0x41   :  { %548 = vmatpush3.bf16.msra.mxu0 %v545_v8  ;;  %576 = vmatpush3.bf16.msra.mxu1 %v573_v17  ;;  %v597_v49 = vpack.c.bf16 %v184_v48, %v183_v47  ;;  %v270_v51 = vld [vmem:[#allocation6 + $0x8] sm:$0xff]  ;;  %v271_v52 = vld [vmem:[#allocation6 + $0x10] sm:$0xff]  ;;  %v272_v54 = vld [vmem:[#allocation6 + $0x18] sm:$0xff] }
  0x42   :  { %550 = vmatprep.subr.bf16.mxu0 %v549_v20  ;;  %578 = vmatprep.subr.bf16.mxu1 %v577_v23  ;;  %v601_v53 = vpack.c.bf16 %v270_v51, %v269_v50  ;;  %v605_v55 = vpack.c.bf16 %v272_v54, %v271_v52  ;;  %v273_v56 = vld [vmem:[#allocation6 + $0x20] sm:$0xff]  ;;  %v274_v57 = vld [vmem:[#allocation6 + $0x28] sm:$0xff]  ;;  %v275_v59 = vld [vmem:[#allocation6 + $0x30] sm:$0xff] }
  0x43   :  { %v609_v58 = vpack.c.bf16 %v274_v57, %v273_v56  ;;  %v276_v60 = vld [vmem:[#allocation6 + $0x38] sm:$0xff]  ;;  %v277_v62 = vld [vmem:[#allocation6 + $0x40] sm:$0xff]  ;;  %v278_v63 = vld [vmem:[#allocation6 + $0x48] sm:$0xff] }
  0x44   :  { %v613_v61 = vpack.c.bf16 %v276_v60, %v275_v59  ;;  %v617_v0 = vpack.c.bf16 %v278_v63, %v277_v62  ;;  %v279_v1 = vld [vmem:[#allocation6 + $0x50] sm:$0xff]  ;;  %v280_v2 = vld [vmem:[#allocation6 + $0x58] sm:$0xff]  ;;  %v281_v4 = vld [vmem:[#allocation6 + $0x60] sm:$0xff] }
  0x45   :  { %552 = vmatpush3.bf16.msra.mxu0 %v549_v20  ;;  %580 = vmatpush3.bf16.msra.mxu1 %v577_v23  ;;  %v621_v3 = vpack.c.bf16 %v280_v2, %v279_v1  ;;  %v282_v5 = vld [vmem:[#allocation6 + $0x68] sm:$0xff]  ;;  %v375_v7 = vld [vmem:[%s828_s2] ss:$0 sm:$0xff]  ;;  %v283_v14 = vld [vmem:[#allocation6 + $0x70] sm:$0xff] }
  0x46   :  { %554 = vmatprep.subr.bf16.mxu0 %v553_v26  ;;  %582 = vmatprep.subr.bf16.mxu1 %v581_v29  ;;  %v625_v6 = vpack.c.bf16 %v282_v5, %v281_v4  ;;  %v284_v15 = vld [vmem:[#allocation6 + $0x78] sm:$0xff]  ;;  %v376_v17 = vld [vmem:[%s830_s4] ss:$0 sm:$0xff] }
  0x47   :  { %v629_v16 = vpack.c.bf16 %v284_v15, %v283_v14  ;;  %v377_v24 = vld [vmem:[%s832_s6] ss:$0 sm:$0xff] }
  0x49   :  { %556 = vmatpush3.bf16.msra.mxu0 %v553_v26  ;;  %584 = vmatpush3.bf16.msra.mxu1 %v581_v29 }
  0x4a   :  { %558 = vmatprep.subr.bf16.mxu0 %v557_v32  ;;  %586 = vmatprep.subr.bf16.mxu1 %v585_v35 }
  0x4d   :  { %560 = vmatpush3.bf16.msra.mxu0 %v557_v32  ;;  %588 = vmatpush3.bf16.msra.mxu1 %v585_v35 }
  0x4e   :  { %562 = vmatprep.subr.bf16.mxu0 %v561_v38  ;;  %590 = vmatprep.subr.bf16.mxu1 %v589_v41 }
  0x51   :  { %564 = vmatpush3.bf16.msra.mxu0 %v561_v38  ;;  %592 = vmatpush3.bf16.msra.mxu1 %v589_v41 }
  0x52   :  { %566 = vmatprep.subr.bf16.mxu0 %v565_v44  ;;  %594 = vmatprep.subr.bf16.mxu1 %v593_v45 }
  0x55   :  { %568 = vmatpush3.bf16.msra.mxu0 %v565_v44  ;;  %596 = vmatpush3.bf16.msra.mxu1 %v593_v45 }
  0x56   :  { %598 = vmatprep.subr.bf16.mxu1 %v597_v49  ;;  %602 = vmatprep.subr.bf16.mxu0 %v601_v53 }
  0x58   :  { %465 = vmatmul.mubr.f32.vlgmr.msra.gmra.mrb[0].mxu0 %v68_v46 }
  0x59   :  { %600 = vmatpush3.bf16.msra.mxu1 %v597_v49  ;;  %604 = vmatpush3.bf16.msra.mxu0 %v601_v53 }
  0x5a   :  { %606 = vmatprep.subr.bf16.mxu0 %v605_v55 }
  0x5d   :  { %608 = vmatpush3.bf16.msra.mxu0 %v605_v55 }
  0x5e   :  { %610 = vmatprep.subr.bf16.mxu0 %v609_v58 }
  0x61   :  { %612 = vmatpush3.bf16.msra.mxu0 %v609_v58 }
  0x62   :  { %614 = vmatprep.subr.bf16.mxu0 %v613_v61 }
  0x65   :  { %616 = vmatpush3.bf16.msra.mxu0 %v613_v61 }
  0x66   :  { %618 = vmatprep.subr.bf16.mxu0 %v617_v0 }
  0x69   :  { %620 = vmatpush3.bf16.msra.mxu0 %v617_v0 }
  0x6a   :  { %622 = vmatprep.subr.bf16.mxu0 %v621_v3 }
  0x6d   :  { %624 = vmatpush3.bf16.msra.mxu0 %v621_v3 }
  0x6e   :  { %626 = vmatprep.subr.bf16.mxu0 %v625_v6 }
  0x71   :  { %628 = vmatpush3.bf16.msra.mxu0 %v625_v6 }
  0x72   :  { %630 = vmatprep.subr.bf16.mxu0 %v629_v16 }
  0x75   :  { %632 = vmatpush3.bf16.msra.mxu0 %v629_v16 }
 0x12b   :  { %v466_v8 = vpop.f32.mrb[0].mxu0 }
 0x12c   :  { %v164_v9 = vadd.f32 %v466_v8, %v375_v7  ;;  %v158_v10 = vpop.f32.mrb[1].mxu0 }
 0x12d   :  { %v159_v11 = vadd.f32 %v375_v7, %v158_v10 }
 0x12e   :  { %v168_v13 = vmax.f32 %v164_v9, 0.0 }
 0x12f   :  { %v167_v12 = vmax.f32 %v159_v11, 0.0 }
 0x131   :  { %499 = vmatprep.mubr.f32.mxu1 %v167_v12 }
 0x132   :  { %500 = vmatmul.mubr.f32.vlgmr.msra.gmra.mrb[0].mxu1 %v168_v13 }
 0x205   :  { %v501_v18 = vpop.f32.mrb[0].mxu1 }
 0x206   :  { %v264_v19 = vadd.f32 %v501_v18, %v376_v17  ;;  %v258_v20 = vpop.f32.mrb[1].mxu1 }
 0x207   :  { %v259_v21 = vadd.f32 %v376_v17, %v258_v20 }
 0x208   :  { %v268_v23 = vmax.f32 %v264_v19, 0.0 }
 0x209   :  { %v267_v22 = vmax.f32 %v259_v21, 0.0 }
 0x20b   :  { %534 = vmatprep.mubr.f32.mxu0 %v267_v22 }
 0x20c   :  { %535 = vmatmul.mubr.f32.vlgmr.msra.gmra.mrb[2].mxu0 %v268_v23 }
 0x2df   :  { %v536_v25 = vpop.f32.mrb[2].mxu0 }
 0x2e0   :  { %v364_v26 = vadd.f32 %v536_v25, %v377_v24  ;;  %v358_v27 = vpop.f32.mrb[3].mxu0 }
 0x2e1   :  { %v359_v28 = vadd.f32 %v377_v24, %v358_v27 }
 0x2e2   :  { %368 = vst [vmem:[%s833_s7 + $0x8] sm:$0xff] %v364_v26 }
 0x2e3   :  { %367 = vst [vmem:[%s833_s7] sm:$0xff] %v359_v28 }
 0x2e4   :  { %373 = vsyncpa [#allocation3], 1 }
 0x2e5   :  { %374 = vsyncpa [#allocation5], 1 }

</bundles_post_ra>
